<compile_context>
chip_gen: v6e
topology: v6e:2x2x1
jax: 0.10.0
libtpu: 0.0.40
codegen_flags: <defaults>
</compile_context>

<pallas_src>
import functools

import jax
import jax.numpy as jnp
from jax import lax
from jax.experimental import pallas as pl
from jax.experimental.pallas import tpu as pltpu


def _round_up(n, m):
    return ((n + m - 1) // m) * m


def _make_mlp_kernel(inner_rows, n_chunks):
    """Builds the fused MLP kernel for a (eff_block_b = inner_rows*n_chunks) tile."""

    def kernel(x_ref, w1_ref, b1_ref, w2_ref, b2_ref, w3_ref, b3_ref, o_ref):
        def chunk_fwd(r0):
            # Three chained MXU matmuls with f32 accumulation + VPU ReLUs,
            # bounded to `inner_rows` rows so h1/h2 don't spill the whole tile.
            x = x_ref[pl.ds(r0, inner_rows), :]
            h1 = jnp.dot(x, w1_ref[...], preferred_element_type=jnp.float32) + b1_ref[...]
            h1 = jnp.maximum(h1, 0.0).astype(w2_ref.dtype)
            h2 = jnp.dot(h1, w2_ref[...], preferred_element_type=jnp.float32) + b2_ref[...]
            h2 = jnp.maximum(h2, 0.0).astype(w3_ref.dtype)
            h3 = jnp.dot(h2, w3_ref[...], preferred_element_type=jnp.float32) + b3_ref[...]
            o_ref[pl.ds(r0, inner_rows), :] = h3.astype(o_ref.dtype)

        if n_chunks == 1:
            chunk_fwd(0)
        else:
            def body(c, carry):
                chunk_fwd(pl.multiple_of(c * inner_rows, inner_rows))
                return carry

            lax.fori_loop(0, n_chunks, body, 0, unroll=True)

    return kernel


@functools.partial(jax.jit, static_argnames=("block_b", "inner_rows", "compute_dtype"))
def h10_mlp_forward(x, w1, b1, w2, b2, w3, b3, *, block_b=512, inner_rows=128,
                    compute_dtype=jnp.float32):
    """Pallas TPU implementation of H10_MLP.forward.

    x : (B, input_dim), any float dtype (cast like `x.to(torch.float32)` or to
        compute_dtype for the bf16 fast path).
    w1: (input_dim, 256), b1: (256,) or (1, 256)
    w2: (256, 128),       b2: (128,) or (1, 128)
    w3: (128, C),         b3: (C,)   or (1, C)
    returns (B, C) float32.
    """
    B, input_dim = x.shape
    H1 = w1.shape[1]  # 256
    H2 = w2.shape[1]  # 128
    C = w3.shape[1]   # num_classes

    # ---- batch tiling: pad B only to a multiple of 8 (sublane) --------------
    B_pad8 = _round_up(B, 8)
    block_b = max(8, _round_up(block_b, 8))
    if B_pad8 <= block_b:
        if B_pad8 >= 256:
            # Whole batch would fit one tile: split into two grid steps so the
            # "parallel" axis can shard across both v7x TensorCores.
            eff_block_b = _round_up((B_pad8 + 1) // 2, 8)
        else:
            eff_block_b = B_pad8
    else:
        eff_block_b = block_b
    grid_b = pl.cdiv(B_pad8, eff_block_b)  # ragged last tile handled by Pallas

    # ---- inner chunking (bound h1/h2 live ranges) ---------------------------
    inner_rows_eff = max(8, _round_up(min(inner_rows, eff_block_b), 8))
    if eff_block_b % inner_rows_eff != 0:
        inner_rows_eff = eff_block_b  # single chunk for awkward tile sizes
    n_chunks = eff_block_b // inner_rows_eff

    # ---- wrapper-side plumbing: cast, tiny row pad, bias reshape ------------
    x_p = x.astype(compute_dtype)
    if B_pad8 != B:
        x_p = jnp.pad(x_p, ((0, B_pad8 - B), (0, 0)))  # at most 7 rows
    w1_p = w1.astype(compute_dtype)
    w2_p = w2.astype(compute_dtype)
    w3_p = w3.astype(compute_dtype)
    b1_p = b1.reshape(1, H1).astype(jnp.float32)
    b2_p = b2.reshape(1, H2).astype(jnp.float32)
    b3_p = b3.reshape(1, C).astype(jnp.float32)

    # ---- cost estimate + VMEM budget ----------------------------------------
    cd_size = jnp.dtype(compute_dtype).itemsize
    weight_bytes = (input_dim * H1 + H1 * H2 + H2 * C) * cd_size + (H1 + H2 + C) * 4
    flops = 2 * B_pad8 * (input_dim * H1 + H1 * H2 + H2 * C)
    bytes_accessed = (
        B_pad8 * input_dim * cd_size + weight_bytes + B_pad8 * C * 4
    )

    io_tile_bytes = eff_block_b * (input_dim * cd_size + C * 4)
    interm_bytes = 2 * inner_rows_eff * (H1 + H2) * 4  # h1/h2 f32 scratch headroom
    vmem_est = 2 * io_tile_bytes + 2 * weight_bytes + interm_bytes
    compiler_kwargs = {"dimension_semantics": ("parallel",)}
    if vmem_est > 12 * 1024 * 1024:
        # Only relevant if block_b is pushed very high (v5e scoped default = 16 MiB).
        compiler_kwargs["vmem_limit_bytes"] = int(min(2 * vmem_est, 60 * 1024 * 1024))

    out = pl.pallas_call(
        _make_mlp_kernel(inner_rows_eff, n_chunks),
        out_shape=jax.ShapeDtypeStruct((B_pad8, C), jnp.float32),
        grid_spec=pltpu.PrefetchScalarGridSpec(
            num_scalar_prefetch=0,
            grid=(grid_b,),
            in_specs=[
                pl.BlockSpec((eff_block_b, input_dim), lambda i: (i, 0)),  # x tile
                pl.BlockSpec((input_dim, H1), lambda i: (0, 0)),           # w1 (resident)
                pl.BlockSpec((1, H1), lambda i: (0, 0)),                   # b1
                pl.BlockSpec((H1, H2), lambda i: (0, 0)),                  # w2
                pl.BlockSpec((1, H2), lambda i: (0, 0)),                   # b2
                pl.BlockSpec((H2, C), lambda i: (0, 0)),                   # w3
                pl.BlockSpec((1, C), lambda i: (0, 0)),                    # b3
            ],
            out_specs=pl.BlockSpec((eff_block_b, C), lambda i: (i, 0)),
        ),
        compiler_params=pltpu.CompilerParams(**compiler_kwargs),
        cost_estimate=pl.CostEstimate(
            flops=flops, transcendentals=0, bytes_accessed=bytes_accessed),
    )(x_p, w1_p, b1_p, w2_p, b2_p, w3_p, b3_p)

    return out[:B]


def init_linear_params(key, fan_in, fan_out):
    """Deterministic init mimicking nn.Linear's default U(-1/sqrt(fan_in), ...).

    Returns W in (fan_in, fan_out) layout (transposed vs PyTorch) and b as (1, fan_out).
    """
    kw, kb = jax.random.split(key)
    bound = 1.0 / jnp.sqrt(jnp.float32(fan_in))
    w = jax.random.uniform(kw, (fan_in, fan_out), jnp.float32, -bound, bound)
    b = jax.random.uniform(kb, (1, fan_out), jnp.float32, -bound, bound)
    return w, b


if __name__ == "__main__":
    input_dim, num_classes = 32, 10

    root = jax.random.PRNGKey(0)
    kx, k1, k2, k3, kx2 = jax.random.split(root, 5)

    w1, b1 = init_linear_params(k1, input_dim, 256)
    w2, b2 = init_linear_params(k2, 256, 128)
    w3, b3 = init_linear_params(k3, 128, num_classes)

    def ref_forward(x):
        h1 = jnp.maximum(x @ w1 + b1, 0.0)
        h2 = jnp.maximum(h1 @ w2 + b2, 0.0)
        return h2 @ w3 + b3

    # Small-shape check (single tile, single inner chunk).
    x = jax.random.normal(kx, (8, input_dim), jnp.float32)
    out = jax.block_until_ready(h10_mlp_forward(x, w1, b1, w2, b2, w3, b3))
    assert out.shape == (8, num_classes)
    assert out.dtype == jnp.float32
    assert jnp.allclose(out, ref_forward(x), atol=5e-4, rtol=5e-4), "f32 small-batch mismatch"

    # Non-multiple batch: exercises the >=2-step grid split (both v7x TCs),
    # the tiny 8-row pad and the masked ragged output writeback.
    xb = jax.random.normal(kx2, (300, input_dim), jnp.float32)
    out_b = jax.block_until_ready(h10_mlp_forward(xb, w1, b1, w2, b2, w3, b3))
    assert out_b.shape == (300, num_classes)
    assert jnp.allclose(out_b, ref_forward(xb), atol=5e-4, rtol=5e-4), "f32 ragged-batch mismatch"

    # bf16-operand fast-MXU path (recommended on v5e/v6e/v7x): f32 accumulation,
    # biases added in f32 post-accumulation; loose tolerance.
    out_bf16 = jax.block_until_ready(
        h10_mlp_forward(xb, w1, b1, w2, b2, w3, b3, compute_dtype=jnp.bfloat16))
    assert out_bf16.shape == (300, num_classes)
    assert jnp.allclose(out_bf16, ref_forward(xb), atol=6e-2, rtol=6e-2), "bf16 mismatch"

    print("KERNEL_OK")
</pallas_src>

<mosaic_0001>
module attributes {stable_mosaic.version = 11 : i64} {
  func.func @kernel(%arg0: i32, %arg1: memref<8x32xf32, #tpu.memory_space<vmem>>, %arg2: memref<32x256xf32, #tpu.memory_space<vmem>>, %arg3: memref<1x256xf32, #tpu.memory_space<vmem>>, %arg4: memref<256x128xf32, #tpu.memory_space<vmem>>, %arg5: memref<1x128xf32, #tpu.memory_space<vmem>>, %arg6: memref<128x10xf32, #tpu.memory_space<vmem>>, %arg7: memref<1x10xf32, #tpu.memory_space<vmem>>, %arg8: memref<8x10xf32, #tpu.memory_space<vmem>>) attributes {dimension_semantics = [#tpu.dimension_semantics<parallel>], iteration_bounds = array<i64: 1>, scalar_prefetch = 0 : i64, scratch_operands = 0 : i64, tpu.core_type = #tpu.core_type<tc>, window_params = [{transform_indices = @transform_0, window_bounds = array<i64: 8, 32>}, {pipeline_mode = #tpu.pipeline_mode<synchronous>, transform_indices = @transform_1, window_bounds = array<i64: 32, 256>}, {pipeline_mode = #tpu.pipeline_mode<synchronous>, transform_indices = @transform_2, window_bounds = array<i64: 1, 256>}, {pipeline_mode = #tpu.pipeline_mode<synchronous>, transform_indices = @transform_3, window_bounds = array<i64: 256, 128>}, {pipeline_mode = #tpu.pipeline_mode<synchronous>, transform_indices = @transform_4, window_bounds = array<i64: 1, 128>}, {pipeline_mode = #tpu.pipeline_mode<synchronous>, transform_indices = @transform_5, window_bounds = array<i64: 128, 10>}, {pipeline_mode = #tpu.pipeline_mode<synchronous>, transform_indices = @transform_6, window_bounds = array<i64: 1, 10>}, {transform_indices = @transform_7, window_bounds = array<i64: 8, 10>}]} {
    %c0 = arith.constant 0 : index
    %c0_0 = arith.constant 0 : index
    %0 = vector.load %arg1[%c0, %c0_0] : memref<8x32xf32, #tpu.memory_space<vmem>>, vector<8x32xf32>
    %c0_1 = arith.constant 0 : index
    %c0_2 = arith.constant 0 : index
    %1 = vector.load %arg2[%c0_1, %c0_2] : memref<32x256xf32, #tpu.memory_space<vmem>>, vector<32x256xf32>
    %cst = arith.constant dense<0.000000e+00> : vector<8x256xf32>
    %2 = tpu.matmul %0, %1, %cst {dimension_numbers = #tpu.dot_dimension_numbers<[1], [0], [0], [1], [0, 0, 1, 1], [], []>} : vector<8x32xf32>, vector<32x256xf32>, vector<8x256xf32> -> vector<8x256xf32>
    %c0_3 = arith.constant 0 : index
    %c0_4 = arith.constant 0 : index
    %3 = vector.load %arg3[%c0_3, %c0_4] : memref<1x256xf32, #tpu.memory_space<vmem>>, vector<1x256xf32>
    %4 = vector.broadcast %3 : vector<1x256xf32> to vector<8x256xf32>
    %5 = arith.addf %2, %4 : vector<8x256xf32>
    %cst_5 = arith.constant 0.000000e+00 : f32
    %6 = vector.broadcast %cst_5 : f32 to vector<8x256xf32>
    %7 = arith.maximumf %5, %6 : vector<8x256xf32>
    %c0_6 = arith.constant 0 : index
    %c0_7 = arith.constant 0 : index
    %8 = vector.load %arg4[%c0_6, %c0_7] : memref<256x128xf32, #tpu.memory_space<vmem>>, vector<256x128xf32>
    %cst_8 = arith.constant dense<0.000000e+00> : vector<8x128xf32>
    %9 = tpu.matmul %7, %8, %cst_8 {dimension_numbers = #tpu.dot_dimension_numbers<[1], [0], [0], [1], [0, 0, 1, 1], [], []>} : vector<8x256xf32>, vector<256x128xf32>, vector<8x128xf32> -> vector<8x128xf32>
    %c0_9 = arith.constant 0 : index
    %c0_10 = arith.constant 0 : index
    %10 = vector.load %arg5[%c0_9, %c0_10] : memref<1x128xf32, #tpu.memory_space<vmem>>, vector<1x128xf32>
    %11 = vector.broadcast %10 : vector<1x128xf32> to vector<8x128xf32>
    %12 = arith.addf %9, %11 : vector<8x128xf32>
    %cst_11 = arith.constant 0.000000e+00 : f32
    %13 = vector.broadcast %cst_11 : f32 to vector<8x128xf32>
    %14 = arith.maximumf %12, %13 : vector<8x128xf32>
    %c0_12 = arith.constant 0 : index
    %c0_13 = arith.constant 0 : index
    %15 = vector.load %arg6[%c0_12, %c0_13] : memref<128x10xf32, #tpu.memory_space<vmem>>, vector<128x10xf32>
    %cst_14 = arith.constant dense<0.000000e+00> : vector<8x10xf32>
    %16 = tpu.matmul %14, %15, %cst_14 {dimension_numbers = #tpu.dot_dimension_numbers<[1], [0], [0], [1], [0, 0, 1, 1], [], []>} : vector<8x128xf32>, vector<128x10xf32>, vector<8x10xf32> -> vector<8x10xf32>
    %c0_15 = arith.constant 0 : index
    %c0_16 = arith.constant 0 : index
    %17 = vector.load %arg7[%c0_15, %c0_16] : memref<1x10xf32, #tpu.memory_space<vmem>>, vector<1x10xf32>
    %18 = vector.broadcast %17 : vector<1x10xf32> to vector<8x10xf32>
    %19 = arith.addf %16, %18 : vector<8x10xf32>
    %c0_17 = arith.constant 0 : index
    %c0_18 = arith.constant 0 : index
    %20 = vector.load %arg8[%c0_17, %c0_18] : memref<8x10xf32, #tpu.memory_space<vmem>>, vector<8x10xf32>
    tpu.vector_store %arg8[%c0_17, %c0_18], %19 {strides = array<i32>} : memref<8x10xf32, #tpu.memory_space<vmem>>, vector<8x10xf32>,
    return
  }
  func.func @transform_0(%arg0: i32) -> (i32, i32) {
    %c0_i32 = arith.constant 0 : i32
    %c0_i32_0 = arith.constant 0 : i32
    return %arg0, %c0_i32 : i32, i32
  }
  func.func @transform_1(%arg0: i32) -> (i32, i32) {
    %c0_i32 = arith.constant 0 : i32
    %c0_i32_0 = arith.constant 0 : i32
    %c0_i32_1 = arith.constant 0 : i32
    return %c0_i32, %c0_i32_0 : i32, i32
  }
  func.func @transform_2(%arg0: i32) -> (i32, i32) {
    %c0_i32 = arith.constant 0 : i32
    %c0_i32_0 = arith.constant 0 : i32
    %c0_i32_1 = arith.constant 0 : i32
    return %c0_i32, %c0_i32_0 : i32, i32
  }
  func.func @transform_3(%arg0: i32) -> (i32, i32) {
    %c0_i32 = arith.constant 0 : i32
    %c0_i32_0 = arith.constant 0 : i32
    %c0_i32_1 = arith.constant 0 : i32
    return %c0_i32, %c0_i32_0 : i32, i32
  }
  func.func @transform_4(%arg0: i32) -> (i32, i32) {
    %c0_i32 = arith.constant 0 : i32
    %c0_i32_0 = arith.constant 0 : i32
    %c0_i32_1 = arith.constant 0 : i32
    return %c0_i32, %c0_i32_0 : i32, i32
  }
  func.func @transform_5(%arg0: i32) -> (i32, i32) {
    %c0_i32 = arith.constant 0 : i32
    %c0_i32_0 = arith.constant 0 : i32
    %c0_i32_1 = arith.constant 0 : i32
    return %c0_i32, %c0_i32_0 : i32, i32
  }
  func.func @transform_6(%arg0: i32) -> (i32, i32) {
    %c0_i32 = arith.constant 0 : i32
    %c0_i32_0 = arith.constant 0 : i32
    %c0_i32_1 = arith.constant 0 : i32
    return %c0_i32, %c0_i32_0 : i32, i32
  }
  func.func @transform_7(%arg0: i32) -> (i32, i32) {
    %c0_i32 = arith.constant 0 : i32
    %c0_i32_0 = arith.constant 0 : i32
    return %arg0, %c0_i32 : i32, i32
  }
}

</mosaic_0001>

<bundles_post_ra>
// kernel: h10_mlp_forward.1
= control target key start
LH: loop header
LB: loop body
LE: loop exit
PB: predicated region body
PF: predicated region fallthrough
CT: control target
= control target key end

     0   :  { %12 = vsyncpa [#allocation3], 0  ;;  %s653_s0 = inlined_call_operand.vmem [shape: f32[8,32], index: 0, kind: input, shape index: {}]   ;;  %s654_s1 = inlined_call_operand.vmem [shape: f32[32,256], index: 1, kind: input, shape index: {}]   ;;  %s655_s2 = inlined_call_operand.vmem [shape: f32[1,256], index: 2, kind: input, shape index: {}]   ;;  %s656_s3 = inlined_call_operand.hbm [shape: f32[256,128], index: 3, kind: input, shape index: {}]   ;;  %s657_s4 = inlined_call_operand.vmem [shape: f32[1,128], index: 4, kind: input, shape index: {}]   ;;  %s658_s5 = inlined_call_operand.vmem [shape: f32[128,10], index: 5, kind: input, shape index: {}]   ;;  %s659_s6 = inlined_call_operand.vmem [shape: f32[1,10], index: 6, kind: input, shape index: {}]   ;;  %s660_s7 = inlined_call_operand.hbm [shape: f32[8,10], index: 7, kind: output, shape index: {}]  }
   0x1   :  { %13 = vsyncpa [#allocation4], 0  ;;  %s499_s24 = smov [#allocation2]  }
   0x2   :  { %s25_s25 = sshll.u32 %s499_s24, 4  ;;  %s26_s25 = int_to_ptr.vmem [resolvable:$true] %s25_s25 }
   0x3   :  { %s463_s26 = scalar_lea.vmem %s26_s25, 4096  ;;  %p468_p1 = scmp.lt.s32.totalorder %s26_s25, %s26_s25 }
   0x4   :  { %p464_p0 = scmp.ne.s32.totalorder %s26_s25, %s463_s26  ;;  %p469_p2 = scmp.lt.s32.totalorder %s463_s26, %s463_s26 }
   0x6   :  { %p470_p3 = por %p469_p2, %p468_p1 }
   0x8   :  { %p471_p4 = pnand %p470_p3, %p464_p0 }
   0xa   :  { %474 = shalt.err (!%p471_p4)
}
   0xb   :  { %s500_s27 = smov 128   ;;  %s501_s28 = smov 8  }
   0xc   :  { %31 = dma.hbm_to_vmem [thread:$0]  %s656_s3, 4096, %s26_s25, [#allocation3], %s500_s27, %s500_s27, %s501_s28  }
   0xd   :  { %495 = dma.done.wait [#allocation3], 4096  }
   0xe   :  { %496 = vsyncadd [#allocation3], 4294963200  ;;  %v502_v0 = vmov 0.0   ;;  %v49_v1 = vld [vmem:[%s654_s1 + $0x38] sm:$0xff]  ;;  %v48_v2 = vld [vmem:[%s654_s1 + $0x30] sm:$0xff]  ;;  %vm62_vm0 = vcmask 261120   ;;  %v52_v53 = vlaneseq }
   0xf   :  { %130 = vmatprep.mubr.f32.mxu0 %v502_v0  ;;  %v47_v3 = vld [vmem:[%s654_s1 + $0x28] sm:$0xff]  ;;  %90 = vmatprep.subr.mxu0 %v49_v1  ;;  %v46_v4 = vld [vmem:[%s654_s1 + $0x20] sm:$0xff]  ;;  %v45_v5 = vld [vmem:[%s654_s1 + $0x18] sm:$0xff]  ;;  %vm503_vm1 = vmmov 0   ;;  %s504_s11 = smov [#allocation5]   ;;  %vm342_vm2 = vcmask 80896  }
  0x10   :  { %91 = vmatpush1.msra.mxu0 %v48_v2  ;;  %v44_v6 = vld [vmem:[%s654_s1 + $0x10] sm:$0xff]  ;;  %v170_v7 = vld [vmem:[#allocation2 + $0xf8] sm:$0xff]  ;;  %v43_v10 = vld [vmem:[%s654_s1 + $0x8] sm:$0xff]  ;;  %v53_v54 = vshrl.u32 %v52_v53, 7 }
  0x11   :  { %92 = vmatprep.subr.mxu0 %v47_v3  ;;  %v154_v8 = vld [vmem:[#allocation2 + $0x78] sm:$0xff]  ;;  %v169_v9 = vld [vmem:[#allocation2 + $0xf0] sm:$0xff]  ;;  %362 = vmatprep.subr.mxu1 %v170_v7  ;;  %v42_v12 = vld [vmem:[%s654_s1] sm:$0xff] }
  0x12   :  { %93 = vmatpush1.msra.mxu0 %v46_v4  ;;  %v153_v11 = vld [vmem:[#allocation2 + $0x70] sm:$0xff]  ;;  %363 = vmatpush3.msra.mxu1 %v154_v8  ;;  %v168_v13 = vld [vmem:[#allocation2 + $0xe8] sm:$0xff]  ;;  %v41_v14 = vld [vmem:[%s653_s0] sm:$0xff]  ;;  %v54_v55 = vsub.s32 0, %v53_v54  ;;  %v58_v57 = vsub.s32 1, %v53_v54 }
  0x13   :  { %94 = vmatprep.subr.mxu0 %v45_v5  ;;  %364 = vmatprep.subr.mxu1 %v169_v9  ;;  %v152_v15 = vld [vmem:[#allocation2 + $0x68] sm:$0xff]  ;;  %v167_v16 = vld [vmem:[#allocation2 + $0xe0] sm:$0xff]  ;;  %v166_v18 = vld [vmem:[#allocation2 + $0xd8] sm:$0xff] }
  0x14   :  { %95 = vmatpush1.msra.mxu0 %v44_v6  ;;  %365 = vmatpush3.msra.mxu1 %v153_v11  ;;  %v151_v17 = vld [vmem:[#allocation2 + $0x60] sm:$0xff]  ;;  %v150_v19 = vld [vmem:[#allocation2 + $0x58] sm:$0xff]  ;;  %v165_v20 = vld [vmem:[#allocation2 + $0xd0] sm:$0xff] }
  0x15   :  { %96 = vmatprep.subr.mxu0 %v43_v10  ;;  %366 = vmatprep.subr.mxu1 %v168_v13  ;;  %v149_v21 = vld [vmem:[#allocation2 + $0x50] sm:$0xff]  ;;  %v164_v22 = vld [vmem:[#allocation2 + $0xc8] sm:$0xff]  ;;  %v163_v24 = vld [vmem:[#allocation2 + $0xc0] sm:$0xff] }
  0x16   :  { %97 = vmatpush1.msra.mxu0 %v42_v12  ;;  %367 = vmatpush3.msra.mxu1 %v152_v15  ;;  %v148_v23 = vld [vmem:[#allocation2 + $0x48] sm:$0xff]  ;;  %v147_v25 = vld [vmem:[#allocation2 + $0x40] sm:$0xff]  ;;  %v162_v26 = vld [vmem:[#allocation2 + $0xb8] sm:$0xff] }
  0x17   :  { %359 = vmatmul.mubr.msk.f32.vlgmr.msra.gmra.mxu0 %vm62_vm0, %v41_v14  ;;  %368 = vmatprep.subr.mxu1 %v167_v16  ;;  %v146_v27 = vld [vmem:[#allocation2 + $0x38] sm:$0xff]  ;;  %v161_v28 = vld [vmem:[#allocation2 + $0xb0] sm:$0xff]  ;;  %v160_v30 = vld [vmem:[#allocation2 + $0xa8] sm:$0xff] }
  0x18   :  { %414 = vmatprep.subr.mxu0 %v502_v0  ;;  %369 = vmatpush3.msra.mxu1 %v151_v17  ;;  %v145_v29 = vld [vmem:[#allocation2 + $0x30] sm:$0xff]  ;;  %v144_v31 = vld [vmem:[#allocation2 + $0x28] sm:$0xff]  ;;  %v159_v32 = vld [vmem:[#allocation2 + $0xa0] sm:$0xff] }
  0x19   :  { %370 = vmatprep.subr.mxu1 %v166_v18  ;;  %v143_v33 = vld [vmem:[#allocation2 + $0x20] sm:$0xff]  ;;  %v158_v34 = vld [vmem:[#allocation2 + $0x98] sm:$0xff]  ;;  %v157_v36 = vld [vmem:[#allocation2 + $0x90] sm:$0xff]  ;;  %446 = vmatprep.mubr.msk.f32.mxu0 %vm503_vm1, %v502_v0 }
  0x1a   :  { %371 = vmatpush3.msra.mxu1 %v150_v19  ;;  %v142_v35 = vld [vmem:[#allocation2 + $0x18] sm:$0xff]  ;;  %v141_v37 = vld [vmem:[#allocation2 + $0x10] sm:$0xff]  ;;  %v156_v38 = vld [vmem:[#allocation2 + $0x88] sm:$0xff] }
  0x1b   :  { %372 = vmatprep.subr.mxu1 %v165_v20  ;;  %v140_v39 = vld [vmem:[#allocation2 + $0x8] sm:$0xff]  ;;  %v155_v40 = vld [vmem:[#allocation2 + $0x80] sm:$0xff]  ;;  %v264_v42 = vld [vmem:[%s658_s5 + $0x78] sm:$0xff] }
  0x1c   :  { %373 = vmatpush3.msra.mxu1 %v149_v21  ;;  %v139_v41 = vld [vmem:[#allocation2] sm:$0xff]  ;;  %v263_v43 = vld [vmem:[%s658_s5 + $0x70] sm:$0xff]  ;;  %415 = vmatpush3.msra.mxu0 %v264_v42  ;;  %v262_v44 = vld [vmem:[%s658_s5 + $0x68] sm:$0xff] }
  0x1d   :  { %374 = vmatprep.subr.mxu1 %v164_v22  ;;  %416 = vmatprep.subr.mxu0 %v502_v0  ;;  %v261_v45 = vld [vmem:[%s658_s5 + $0x60] sm:$0xff]  ;;  %v260_v46 = vld [vmem:[%s658_s5 + $0x58] sm:$0xff]  ;;  %v259_v47 = vld [vmem:[%s658_s5 + $0x50] sm:$0xff] }
  0x1e   :  { %375 = vmatpush3.msra.mxu1 %v148_v23  ;;  %417 = vmatpush3.msra.mxu0 %v263_v43  ;;  %v258_v48 = vld [vmem:[%s658_s5 + $0x48] sm:$0xff]  ;;  %v257_v49 = vld [vmem:[%s658_s5 + $0x40] sm:$0xff]  ;;  %v256_v50 = vld [vmem:[%s658_s5 + $0x38] sm:$0xff] }
  0x1f   :  { %376 = vmatprep.subr.mxu1 %v163_v24  ;;  %418 = vmatprep.subr.mxu0 %v502_v0  ;;  %v255_v51 = vld [vmem:[%s658_s5 + $0x30] sm:$0xff]  ;;  %v254_v52 = vld [vmem:[%s658_s5 + $0x28] sm:$0xff]  ;;  %v50_v56 = vld [vmem:[%s655_s2] sm:$0x3] }
  0x20   :  { %377 = vmatpush3.msra.mxu1 %v147_v25  ;;  %419 = vmatpush3.msra.mxu0 %v262_v44  ;;  %v55_v58 = vrot.slane %v50_v56, %v54_v55  ;;  %v59_v59 = vrot.slane %v50_v56, %v58_v57  ;;  %v253_v3 = vld [vmem:[%s658_s5 + $0x20] sm:$0xff]  ;;  %v252_v4 = vld [vmem:[%s658_s5 + $0x18] sm:$0xff]  ;;  %v251_v5 = vld [vmem:[%s658_s5 + $0x10] sm:$0xff] }
  0x21   :  { %378 = vmatprep.subr.mxu1 %v162_v26  ;;  %420 = vmatprep.subr.mxu0 %v502_v0  ;;  %v250_v6 = vld [vmem:[%s658_s5 + $0x8] sm:$0xff]  ;;  %v249_v7 = vld [vmem:[%s658_s5] sm:$0xff]  ;;  %s350_s5 = sshll.u32 %s504_s11, 4  ;;  %s351_s5 = int_to_ptr.vmem [resolvable:$true] %s350_s5 }
  0x22   :  { %379 = vmatpush3.msra.mxu1 %v146_v27  ;;  %421 = vmatpush3.msra.mxu0 %v261_v45  ;;  %v360_v9 = vld [vmem:[%s657_s4] ss:$0 sm:$0xff]  ;;  %s475_s12 = scalar_lea.vmem %s351_s5, 128  ;;  %p480_p6 = scmp.lt.s32.totalorder %s351_s5, %s351_s5 }
  0x23   :  { %380 = vmatprep.subr.mxu1 %v161_v28  ;;  %422 = vmatprep.subr.mxu0 %v502_v0  ;;  %v361_v14 = vld [vmem:[%s659_s6] ss:$0 sm:$0xff]  ;;  %p476_p5 = scmp.ne.s32.totalorder %s351_s5, %s475_s12  ;;  %p481_p7 = scmp.lt.s32.totalorder %s475_s12, %s475_s12 }
  0x24   :  { %381 = vmatpush3.msra.mxu1 %v145_v29  ;;  %423 = vmatpush3.msra.mxu0 %v260_v46 }
  0x25   :  { %382 = vmatprep.subr.mxu1 %v160_v30  ;;  %424 = vmatprep.subr.mxu0 %v502_v0  ;;  %p482_p8 = por %p481_p7, %p480_p6 }
  0x26   :  { %383 = vmatpush3.msra.mxu1 %v144_v31  ;;  %425 = vmatpush3.msra.mxu0 %v259_v47 }
  0x27   :  { %384 = vmatprep.subr.mxu1 %v159_v32  ;;  %426 = vmatprep.subr.mxu0 %v502_v0  ;;  %p483_p9 = pnand %p482_p8, %p476_p5 }
  0x28   :  { %385 = vmatpush3.msra.mxu1 %v143_v33  ;;  %427 = vmatpush3.msra.mxu0 %v258_v48 }
  0x29   :  { %386 = vmatprep.subr.mxu1 %v158_v34  ;;  %428 = vmatprep.subr.mxu0 %v502_v0 }
  0x2a   :  { %387 = vmatpush3.msra.mxu1 %v142_v35  ;;  %429 = vmatpush3.msra.mxu0 %v257_v49 }
  0x2b   :  { %388 = vmatprep.subr.mxu1 %v157_v36  ;;  %430 = vmatprep.subr.mxu0 %v502_v0 }
  0x2c   :  { %389 = vmatpush3.msra.mxu1 %v141_v37  ;;  %431 = vmatpush3.msra.mxu0 %v256_v50 }
  0x2d   :  { %390 = vmatprep.subr.mxu1 %v156_v38  ;;  %432 = vmatprep.subr.mxu0 %v502_v0 }
  0x2e   :  { %391 = vmatpush3.msra.mxu1 %v140_v39  ;;  %433 = vmatpush3.msra.mxu0 %v255_v51 }
  0x2f   :  { %392 = vmatprep.subr.mxu1 %v155_v40  ;;  %434 = vmatprep.subr.mxu0 %v502_v0 }
  0x30   :  { %393 = vmatpush3.msra.mxu1 %v139_v41  ;;  %435 = vmatpush3.msra.mxu0 %v254_v52 }
  0x31   :  { %436 = vmatprep.subr.mxu0 %v502_v0 }
  0x32   :  { %437 = vmatpush3.msra.mxu0 %v253_v3 }
  0x33   :  { %438 = vmatprep.subr.mxu0 %v502_v0 }
  0x34   :  { %439 = vmatpush3.msra.mxu0 %v252_v4 }
  0x35   :  { %440 = vmatprep.subr.mxu0 %v502_v0 }
  0x36   :  { %441 = vmatpush3.msra.mxu0 %v251_v5 }
  0x37   :  { %442 = vmatprep.subr.mxu0 %v502_v0 }
  0x38   :  { %443 = vmatpush3.msra.mxu0 %v250_v6 }
  0x39   :  { %444 = vmatprep.subr.mxu0 %v502_v0 }
  0x3a   :  { %445 = vmatpush3.msra.mxu0 %v249_v7 }
  0xd7   :  { %v132_v60 = vpop.f32.mrf.mxu0 }
  0xd8   :  { %v133_v61 = vadd.f32 %v132_v60, %v55_v58 }
  0xd9   :  { %v134_v62 = vpop.f32.mrf.mxu0 }
  0xda   :  { %v135_v63 = vadd.f32 %v134_v62, %v59_v59  ;;  %v137_v2 = vmax.f32 %v133_v61, 0.0 }
  0xdc   :  { %v138_v1 = vmax.f32 %v135_v63, 0.0 }
  0xde   :  { %242 = vmatprep.mubr.f32.mxu1 %v138_v1 }
  0xdf   :  { %243 = vmatmul.mubr.f32.vlgmr.msra.gmra.mxu1 %v137_v2 }
 0x19f   :  { %v394_v8 = vpop.f32.mrf.mxu1 }
 0x1a1   :  { %v395_v10 = vpop.f32.mrf.mxu1 }
 0x1a2   :  { %v396_v11 = vadd.f32 %v395_v10, %v394_v8 }
 0x1a4   :  { %v245_v12 = vadd.f32 %v396_v11, %v360_v9 }
 0x1a6   :  { %v248_v13 = vmax.f32 %v245_v12, 0.0 }
 0x1a8   :  { %447 = vmatmul.mubr.f32.vlgmr.msra.gmra.mxu0 %v248_v13 }
 0x268   :  { %v338_v15 = vpop.f32.mrf.mxu0 }
 0x269   :  { %v339_v16 = vadd.f32 %v361_v14, %v338_v15 }
 0x26a   :  { %v448_v0 = vpop.f32.mrf.mxu0 }
 0x26b   :  { %343 = vst.msk [vmem:[#allocation5] sm:$0xff] %vm342_vm2, %v339_v16 }
 0x26c   :  { %486 = shalt.err (!%p483_p9)
}
 0x26d   :  { %353 = dma.vmem_to_hbm [thread:$0]  %s351_s5, 128, %s660_s7, [#allocation4]  }
 0x26e   :  { %497 = dma.done.wait [#allocation4], 128  }
 0x26f   :  { %498 = vsyncadd [#allocation4], 4294967168 }
 0x270   :  { %357 = vsyncpa [#allocation3], 1 }
 0x271   :  { %358 = vsyncpa [#allocation4], 1 }

</bundles_post_ra>
